<compile_context>
chip_gen: v7x
topology: tpu7x:2x2x1
jax: 0.10.0
libtpu: 0.0.40
codegen_flags: <defaults>
</compile_context>

<pallas_src>
import functools

import jax
import jax.numpy as jnp
from jax.experimental import pallas as pl
from jax.experimental.pallas import tpu as pltpu


_VMEM_LIMIT_BYTES = 32 * 1024 * 1024   # safe on v5e/v6e (128 MiB) and v7x (64 MiB)
_VMEM_TILE_BUDGET = 20 * 1024 * 1024   # headroom below the scoped limit
_TILE_CANDIDATES = (1024, 512, 256, 128, 64, 32, 16, 8)

_CORE_PARALLEL = getattr(pltpu, "CORE_PARALLEL", None)
_BH_SEMANTICS_CACHE = None  # resolved once per process ("auto" probe result)


def _flash_attn_kernel(q_ref, k_ref, v_ref, o_ref, *scratch,
                       scale_factor, exp_in_bf16):
    """One (b*h) head: q_ref (tq, D), k_ref (tk, D), v_ref (tk, Dv), o_ref (tq, Dv)."""
    if scale_factor:
        m_sc, l_sc, acc_sc, qs_sc = scratch
    else:
        m_sc, l_sc, acc_sc = scratch
        qs_sc = None

    kv = pl.program_id(2)

    @pl.when(kv == 0)
    def _init():
        m_sc[...] = jnp.full_like(m_sc, -jnp.inf)
        l_sc[...] = jnp.zeros_like(l_sc)
        acc_sc[...] = jnp.zeros_like(acc_sc)
        if scale_factor:
            # Scale Q once per (b, i) tile; saves tq*D VPU multiplies on every
            # subsequent kv step.  (Mirrors torch's `if scale_factor:` -- a
            # falsy scale means "no scaling".)
            qv = q_ref[...]
            qs_sc[...] = qv * jnp.asarray(scale_factor, dtype=qv.dtype)

    q = qs_sc[...] if scale_factor else q_ref[...]

    # scores (tq, tk): native-dtype operands, f32 accumulation on the MXU.
    s = jax.lax.dot_general(
        q, k_ref[...],
        dimension_numbers=(((1,), (1,)), ((), ())),
        preferred_element_type=jnp.float32,
    )

    # Online softmax update.
    m_prev = m_sc[...]
    m_new = jnp.maximum(m_prev, jnp.max(s, axis=-1, keepdims=True))
    alpha = jnp.exp(m_prev - m_new)

    if exp_in_bf16:
        # bf16 exp on the EUP (~2x the f32 rate on v6e/v7x).  p feeds a bf16
        # PV matmul anyway; the row-sum is re-accumulated in f32.
        p = jnp.exp((s - m_new).astype(jnp.bfloat16))
        p_sum = jnp.sum(p.astype(jnp.float32), axis=-1, keepdims=True)
        pv = jnp.dot(p, v_ref[...], preferred_element_type=jnp.float32)
    else:
        p = jnp.exp(s - m_new)
        p_sum = jnp.sum(p, axis=-1, keepdims=True)
        pv = jnp.dot(p.astype(v_ref.dtype), v_ref[...],
                     preferred_element_type=jnp.float32)

    l_sc[...] = alpha * l_sc[...] + p_sum
    acc_sc[...] = alpha * acc_sc[...] + pv
    m_sc[...] = m_new

    @pl.when(kv == pl.num_programs(2) - 1)
    def _finalize():
        inv_l = pl.reciprocal(l_sc[...], approx=True)  # EUP slot, ~free
        o_ref[...] = (acc_sc[...] * inv_l).astype(o_ref.dtype)


def _pick_tile(dim, preferred):
    """Largest tile <= preferred that divides `dim` and is sublane-friendly."""
    if preferred <= dim and dim % preferred == 0:
        return preferred
    for t in _TILE_CANDIDATES:
        if t <= preferred and dim % t == 0:
            return t
    return dim  # full extent (always legal for a BlockSpec)


def _vmem_bytes_estimate(tq, tk, D, Dv, in_itemsize):
    """Rough footprint: double-buffered tiles + scratch + f32 score intermediates."""
    io = 2 * (tq * D + tk * D + tk * Dv + tq * Dv) * in_itemsize
    scratch = tq * Dv * 4 + 2 * tq * 4 + tq * D * in_itemsize
    interm = 3 * tq * tk * 4  # s / p / compiler re-tiling copies
    return io + scratch + interm


def dot_product_attention(query, key, value, scale_factor=None, *,
                          tq=512, tk=512, kv_buffers=None,
                          core_parallel_bh="auto"):
    """query (B,H,Sq,D), key (B,H,Sk,D), value (B,H,Sk,Dv) -> (B,H,Sq,Dv).

    kv_buffers: optional K/V pipeline depth (e.g. 3 on v5e); None = default.
    core_parallel_bh: "auto" (probe CORE_PARALLEL, fall back), True, or False.
    """
    global _BH_SEMANTICS_CACHE

    B, H, Sq, D = query.shape
    Sk = key.shape[2]
    Dv = value.shape[3]
    BH = B * H

    q = query.reshape(BH, Sq, D)
    k = key.reshape(BH, Sk, D)
    v = value.reshape(BH, Sk, Dv)

    tq = _pick_tile(Sq, tq)
    tk = _pick_tile(Sk, tk)
    # Bound the VMEM footprint (important on v7x: 64 MiB physical VMEM).
    for _ in range(8):
        if _vmem_bytes_estimate(tq, tk, D, Dv, q.dtype.itemsize) <= _VMEM_TILE_BUDGET:
            break
        if tk >= tq and tk > 128:
            tk = _pick_tile(Sk, max(tk // 2, 128))
        elif tq > 128:
            tq = _pick_tile(Sq, max(tq // 2, 128))
        else:
            break

    grid = (BH, Sq // tq, Sk // tk)
    exp_in_bf16 = (v.dtype == jnp.bfloat16)

    kernel = functools.partial(_flash_attn_kernel,
                               scale_factor=scale_factor,
                               exp_in_bf16=exp_in_bf16)

    # Optional deeper K/V buffering (v5e tuning knob); default path is untouched.
    kv_spec_kwargs = {}
    if kv_buffers is not None:
        kv_spec_kwargs["pipeline_mode"] = pl.Buffered(kv_buffers)

    scratch_shapes = [
        pltpu.VMEM((tq, 1), jnp.float32),    # running max m
        pltpu.VMEM((tq, 1), jnp.float32),    # running sum l
        pltpu.VMEM((tq, Dv), jnp.float32),   # f32 output accumulator
    ]
    if scale_factor:
        scratch_shapes.append(pltpu.VMEM((tq, D), q.dtype))  # pre-scaled Q tile

    def build(bh_semantics):
        return pl.pallas_call(
            kernel,
            out_shape=jax.ShapeDtypeStruct((BH, Sq, Dv), query.dtype),
            grid_spec=pltpu.PrefetchScalarGridSpec(
                num_scalar_prefetch=0,
                grid=grid,
                in_specs=[
                    # Q tile stays resident across the kv reduction axis.
                    pl.BlockSpec((pl.Squeezed(), tq, D), lambda b, i, j: (b, i, 0)),
                    # K/V tiles stream along the innermost axis.
                    pl.BlockSpec((pl.Squeezed(), tk, D), lambda b, i, j: (b, j, 0),
                                 **kv_spec_kwargs),
                    pl.BlockSpec((pl.Squeezed(), tk, Dv), lambda b, i, j: (b, j, 0),
                                 **kv_spec_kwargs),
                ],
                out_specs=pl.BlockSpec((pl.Squeezed(), tq, Dv),
                                       lambda b, i, j: (b, i, 0)),
                scratch_shapes=scratch_shapes,
            ),
            compiler_params=pltpu.CompilerParams(
                dimension_semantics=(bh_semantics, "parallel", "arbitrary"),
                vmem_limit_bytes=_VMEM_LIMIT_BYTES,
            ),
        )

    # Resolve the BH-axis semantics: CORE_PARALLEL shards it across the 2
    # TensorCores on v7x; fall back to plain "parallel" where unsupported.
    if core_parallel_bh is False or _CORE_PARALLEL is None:
        candidates = ["parallel"]
    elif core_parallel_bh is True:
        candidates = [_CORE_PARALLEL]
    elif _BH_SEMANTICS_CACHE is not None:
        candidates = [_BH_SEMANTICS_CACHE]
    else:  # "auto", first call: probe, then cache.
        candidates = [_CORE_PARALLEL, "parallel"]

    out = None
    last_err = None
    for sem in candidates:
        try:
            result = build(sem)(q, k, v)
            jax.block_until_ready(result)
        except Exception as err:  # lowering/runtime probe failure -> fall back
            last_err = err
            continue
        _BH_SEMANTICS_CACHE = sem
        out = result
        break
    if out is None:
        raise last_err

    return out.reshape(B, H, Sq, Dv)


def _reference(query, key, value, scale_factor=None):
    qf = query.astype(jnp.float32)
    kf = key.astype(jnp.float32)
    vf = value.astype(jnp.float32)
    qk = jnp.einsum("bhqd,bhkd->bhqk", qf, kf)
    if scale_factor:
        qk = qk * scale_factor
    p = jax.nn.softmax(qk, axis=-1)
    return jnp.einsum("bhqk,bhkd->bhqd", p, vf)


if __name__ == "__main__":
    rng = jax.random.PRNGKey(0)

    # --- Test 1: small shape, single tile per (b, h), with scale. ---
    B, H, Sq, Sk, D = 2, 2, 8, 8, 32
    kq, kk, kv_, rng = jax.random.split(rng, 4)
    query = jax.random.normal(kq, (B, H, Sq, D), dtype=jnp.float32)
    key = jax.random.normal(kk, (B, H, Sk, D), dtype=jnp.float32)
    value = jax.random.normal(kv_, (B, H, Sk, D), dtype=jnp.float32)
    scale = 1.0 / (D ** 0.5)

    out = jax.block_until_ready(
        dot_product_attention(query, key, value, scale_factor=scale))
    ref = _reference(query, key, value, scale_factor=scale)
    assert out.shape == ref.shape
    assert jnp.allclose(out, ref, atol=1e-2, rtol=1e-2), "mismatch (small, scaled)"

    # No-scale path (mirrors the torch `if scale_factor:` falsy branch).
    out2 = jax.block_until_ready(dot_product_attention(query, key, value))
    ref2 = _reference(query, key, value)
    assert jnp.allclose(out2, ref2, atol=1e-2, rtol=1e-2), "mismatch (no scale)"

    # --- Test 2: multi-tile online-softmax path (several kv steps). ---
    B2, H2, Sq2, Sk2, D2 = 1, 2, 128, 128, 32
    kq2, kk2, kv2, rng = jax.random.split(rng, 4)
    q2 = jax.random.normal(kq2, (B2, H2, Sq2, D2), dtype=jnp.float32)
    k2 = jax.random.normal(kk2, (B2, H2, Sk2, D2), dtype=jnp.float32)
    v2 = jax.random.normal(kv2, (B2, H2, Sk2, D2), dtype=jnp.float32)
    scale2 = 1.0 / (D2 ** 0.5)
    ref3 = _reference(q2, k2, v2, scale_factor=scale2)

    out3 = jax.block_until_ready(
        dot_product_attention(q2, k2, v2, scale_factor=scale2, tq=64, tk=64))
    assert jnp.allclose(out3, ref3, atol=1e-2, rtol=1e-2), "mismatch (tiled)"

    # Same shape through the default (large-tile) path.
    out3b = jax.block_until_ready(
        dot_product_attention(q2, k2, v2, scale_factor=scale2))
    assert jnp.allclose(out3b, ref3, atol=1e-2, rtol=1e-2), "mismatch (default tiles)"

    # --- Test 3: bf16 operands (native MXU path + bf16 exp), looser tolerance. ---
    q_bf, k_bf, v_bf = (x.astype(jnp.bfloat16) for x in (q2, k2, v2))
    out4 = jax.block_until_ready(
        dot_product_attention(q_bf, k_bf, v_bf, scale_factor=scale2, tq=64, tk=64))
    ref4 = _reference(q_bf, k_bf, v_bf, scale_factor=scale2)
    assert jnp.allclose(out4.astype(jnp.float32), ref4, atol=3e-2, rtol=3e-2), \
        "mismatch (bf16)"

    print("KERNEL_OK")
</pallas_src>

<mosaic_0001>
module attributes {stable_mosaic.version = 11 : i64} {
  func.func @_flash_attn_kernel(%arg0: i32, %arg1: i32, %arg2: i32, %arg3: memref<1x8x32xf32, #tpu.memory_space<vmem>>, %arg4: memref<1x8x32xf32, #tpu.memory_space<vmem>>, %arg5: memref<1x8x32xf32, #tpu.memory_space<vmem>>, %arg6: memref<1x8x32xf32, #tpu.memory_space<vmem>>, %arg7: memref<8x1xf32, #tpu.memory_space<vmem>>, %arg8: memref<8x1xf32, #tpu.memory_space<vmem>>, %arg9: memref<8x32xf32, #tpu.memory_space<vmem>>, %arg10: memref<8x32xf32, #tpu.memory_space<vmem>>) attributes {dimension_semantics = [#tpu.dimension_semantics<core_parallel>, #tpu.dimension_semantics<parallel>, #tpu.dimension_semantics<arbitrary>], iteration_bounds = array<i64: 4, 1, 1>, scalar_prefetch = 0 : i64, scratch_operands = 4 : i64, tpu.core_type = #tpu.core_type<tc>, window_params = [{transform_indices = @transform_0, window_bounds = array<i64: 1, 8, 32>}, {transform_indices = @transform_1, window_bounds = array<i64: 1, 8, 32>}, {transform_indices = @transform_2, window_bounds = array<i64: 1, 8, 32>}, {transform_indices = @transform_3, window_bounds = array<i64: 1, 8, 32>}]} {
    %c0_i32 = arith.constant 0 : i32
    %0 = arith.cmpi eq, %arg2, %c0_i32 : i32
    %1 = arith.extui %0 : i1 to i32
    %c0_i32_0 = arith.constant 0 : i32
    %2 = arith.cmpi ne, %1, %c0_i32_0 : i32
    scf.if %2 {
      %cst_25 = arith.constant 0xFF800000 : f32
      %34 = vector.broadcast %cst_25 : f32 to vector<8x1xf32>
      %c0_26 = arith.constant 0 : index
      %c0_27 = arith.constant 0 : index
      %35 = vector.load %arg7[%c0_26, %c0_27] : memref<8x1xf32, #tpu.memory_space<vmem>>, vector<8x1xf32>
      tpu.vector_store %arg7[%c0_26, %c0_27], %34 {strides = array<i32>} : memref<8x1xf32, #tpu.memory_space<vmem>>, vector<8x1xf32>,
      %cst_28 = arith.constant 0.000000e+00 : f32
      %36 = vector.broadcast %cst_28 : f32 to vector<8x1xf32>
      %c0_29 = arith.constant 0 : index
      %c0_30 = arith.constant 0 : index
      %37 = vector.load %arg8[%c0_29, %c0_30] : memref<8x1xf32, #tpu.memory_space<vmem>>, vector<8x1xf32>
      tpu.vector_store %arg8[%c0_29, %c0_30], %36 {strides = array<i32>} : memref<8x1xf32, #tpu.memory_space<vmem>>, vector<8x1xf32>,
      %cst_31 = arith.constant 0.000000e+00 : f32
      %38 = vector.broadcast %cst_31 : f32 to vector<8x32xf32>
      %c0_32 = arith.constant 0 : index
      %c0_33 = arith.constant 0 : index
      %39 = vector.load %arg9[%c0_32, %c0_33] : memref<8x32xf32, #tpu.memory_space<vmem>>, vector<8x32xf32>
      tpu.vector_store %arg9[%c0_32, %c0_33], %38 {strides = array<i32>} : memref<8x32xf32, #tpu.memory_space<vmem>>, vector<8x32xf32>,
      %c0_34 = arith.constant 0 : index
      %c0_35 = arith.constant 0 : index
      %c0_36 = arith.constant 0 : index
      %40 = vector.load %arg3[%c0_34, %c0_35, %c0_36] : memref<1x8x32xf32, #tpu.memory_space<vmem>>, vector<1x8x32xf32>
      %41 = vector.shape_cast %40 : vector<1x8x32xf32> to vector<8x32xf32>
      %cst_37 = arith.constant 0.176776692 : f32
      %42 = vector.broadcast %cst_37 : f32 to vector<8x32xf32>
      %43 = arith.mulf %41, %42 : vector<8x32xf32>
      %c0_38 = arith.constant 0 : index
      %c0_39 = arith.constant 0 : index
      %44 = vector.load %arg10[%c0_38, %c0_39] : memref<8x32xf32, #tpu.memory_space<vmem>>, vector<8x32xf32>
      tpu.vector_store %arg10[%c0_38, %c0_39], %43 {strides = array<i32>} : memref<8x32xf32, #tpu.memory_space<vmem>>, vector<8x32xf32>,
    } else {
    }
    %c0 = arith.constant 0 : index
    %c0_1 = arith.constant 0 : index
    %3 = vector.load %arg10[%c0, %c0_1] : memref<8x32xf32, #tpu.memory_space<vmem>>, vector<8x32xf32>
    %c0_2 = arith.constant 0 : index
    %c0_3 = arith.constant 0 : index
    %c0_4 = arith.constant 0 : index
    %4 = vector.load %arg4[%c0_2, %c0_3, %c0_4] : memref<1x8x32xf32, #tpu.memory_space<vmem>>, vector<1x8x32xf32>
    %5 = vector.shape_cast %4 : vector<1x8x32xf32> to vector<8x32xf32>
    %cst = arith.constant dense<0.000000e+00> : vector<8x8xf32>
    %6 = tpu.matmul %3, %5, %cst {dimension_numbers = #tpu.dot_dimension_numbers<[1], [1], [0], [0], [0, 0, 1, 0], [], []>} : vector<8x32xf32>, vector<8x32xf32>, vector<8x8xf32> -> vector<8x8xf32>
    %c0_5 = arith.constant 0 : index
    %c0_6 = arith.constant 0 : index
    %7 = vector.load %arg7[%c0_5, %c0_6] : memref<8x1xf32, #tpu.memory_space<vmem>>, vector<8x1xf32>
    %cst_7 = arith.constant dense<0xFF800000> : vector<8xf32>
    %8 = vector.multi_reduction <maximumf>, %6, %cst_7 [1] : vector<8x8xf32> to vector<8xf32>
    %9 = vector.shape_cast %8 : vector<8xf32> to vector<8x1xf32>
    %10 = arith.maximumf %7, %9 : vector<8x1xf32>
    %11 = arith.subf %7, %10 : vector<8x1xf32>
    %12 = math.exp %11 : vector<8x1xf32>
    %13 = vector.broadcast %10 : vector<8x1xf32> to vector<8x8xf32>
    %14 = arith.subf %6, %13 : vector<8x8xf32>
    %15 = math.exp %14 : vector<8x8xf32>
    %cst_8 = arith.constant dense<0.000000e+00> : vector<8xf32>
    %16 = vector.multi_reduction <add>, %15, %cst_8 [1] : vector<8x8xf32> to vector<8xf32>
    %17 = vector.shape_cast %16 : vector<8xf32> to vector<8x1xf32>
    %c0_9 = arith.constant 0 : index
    %c0_10 = arith.constant 0 : index
    %c0_11 = arith.constant 0 : index
    %18 = vector.load %arg5[%c0_9, %c0_10, %c0_11] : memref<1x8x32xf32, #tpu.memory_space<vmem>>, vector<1x8x32xf32>
    %19 = vector.shape_cast %18 : vector<1x8x32xf32> to vector<8x32xf32>
    %cst_12 = arith.constant dense<0.000000e+00> : vector<8x32xf32>
    %20 = tpu.matmul %15, %19, %cst_12 {dimension_numbers = #tpu.dot_dimension_numbers<[1], [0], [0], [1], [0, 0, 1, 1], [], []>} : vector<8x8xf32>, vector<8x32xf32>, vector<8x32xf32> -> vector<8x32xf32>
    %c0_13 = arith.constant 0 : index
    %c0_14 = arith.constant 0 : index
    %21 = vector.load %arg8[%c0_13, %c0_14] : memref<8x1xf32, #tpu.memory_space<vmem>>, vector<8x1xf32>
    %22 = arith.mulf %12, %21 : vector<8x1xf32>
    %23 = arith.addf %22, %17 : vector<8x1xf32>
    %c0_15 = arith.constant 0 : index
    %c0_16 = arith.constant 0 : index
    %24 = vector.load %arg8[%c0_15, %c0_16] : memref<8x1xf32, #tpu.memory_space<vmem>>, vector<8x1xf32>
    tpu.vector_store %arg8[%c0_15, %c0_16], %23 {strides = array<i32>} : memref<8x1xf32, #tpu.memory_space<vmem>>, vector<8x1xf32>,
    %c0_17 = arith.constant 0 : index
    %c0_18 = arith.constant 0 : index
    %25 = vector.load %arg9[%c0_17, %c0_18] : memref<8x32xf32, #tpu.memory_space<vmem>>, vector<8x32xf32>
    %26 = vector.broadcast %12 : vector<8x1xf32> to vector<8x32xf32>
    %27 = arith.mulf %26, %25 : vector<8x32xf32>
    %28 = arith.addf %27, %20 : vector<8x32xf32>
    %c0_19 = arith.constant 0 : index
    %c0_20 = arith.constant 0 : index
    %29 = vector.load %arg9[%c0_19, %c0_20] : memref<8x32xf32, #tpu.memory_space<vmem>>, vector<8x32xf32>
    tpu.vector_store %arg9[%c0_19, %c0_20], %28 {strides = array<i32>} : memref<8x32xf32, #tpu.memory_space<vmem>>, vector<8x32xf32>,
    %c0_21 = arith.constant 0 : index
    %c0_22 = arith.constant 0 : index
    %30 = vector.load %arg7[%c0_21, %c0_22] : memref<8x1xf32, #tpu.memory_space<vmem>>, vector<8x1xf32>
    tpu.vector_store %arg7[%c0_21, %c0_22], %10 {strides = array<i32>} : memref<8x1xf32, #tpu.memory_space<vmem>>, vector<8x1xf32>,
    %c0_i32_23 = arith.constant 0 : i32
    %31 = arith.cmpi eq, %arg2, %c0_i32_23 : i32
    %32 = arith.extui %31 : i1 to i32
    %c0_i32_24 = arith.constant 0 : i32
    %33 = arith.cmpi ne, %32, %c0_i32_24 : i32
    scf.if %33 {
      %c0_25 = arith.constant 0 : index
      %c0_26 = arith.constant 0 : index
      %34 = vector.load %arg8[%c0_25, %c0_26] : memref<8x1xf32, #tpu.memory_space<vmem>>, vector<8x1xf32>
      %35 = tpu.reciprocal %34 {approx = true} : vector<8x1xf32> -> vector<8x1xf32>
      %c0_27 = arith.constant 0 : index
      %c0_28 = arith.constant 0 : index
      %36 = vector.load %arg9[%c0_27, %c0_28] : memref<8x32xf32, #tpu.memory_space<vmem>>, vector<8x32xf32>
      %37 = vector.broadcast %35 : vector<8x1xf32> to vector<8x32xf32>
      %38 = arith.mulf %36, %37 : vector<8x32xf32>
      %c0_29 = arith.constant 0 : index
      %c0_30 = arith.constant 0 : index
      %c0_31 = arith.constant 0 : index
      %39 = vector.load %arg6[%c0_29, %c0_30, %c0_31] : memref<1x8x32xf32, #tpu.memory_space<vmem>>, vector<1x8x32xf32>
      %40 = vector.shape_cast %39 : vector<1x8x32xf32> to vector<8x32xf32>
      %41 = vector.shape_cast %38 : vector<8x32xf32> to vector<1x8x32xf32>
      tpu.vector_store %arg6[%c0_29, %c0_30, %c0_31], %41 {strides = array<i32>} : memref<1x8x32xf32, #tpu.memory_space<vmem>>, vector<1x8x32xf32>,
    } else {
    }
    return
  }
  func.func @transform_0(%arg0: i32, %arg1: i32, %arg2: i32) -> (i32, i32, i32) {
    %c0_i32 = arith.constant 0 : i32
    %c0_i32_0 = arith.constant 0 : i32
    return %arg0, %arg1, %c0_i32 : i32, i32, i32
  }
  func.func @transform_1(%arg0: i32, %arg1: i32, %arg2: i32) -> (i32, i32, i32) {
    %c0_i32 = arith.constant 0 : i32
    %c0_i32_0 = arith.constant 0 : i32
    return %arg0, %arg2, %c0_i32 : i32, i32, i32
  }
  func.func @transform_2(%arg0: i32, %arg1: i32, %arg2: i32) -> (i32, i32, i32) {
    %c0_i32 = arith.constant 0 : i32
    %c0_i32_0 = arith.constant 0 : i32
    return %arg0, %arg2, %c0_i32 : i32, i32, i32
  }
  func.func @transform_3(%arg0: i32, %arg1: i32, %arg2: i32) -> (i32, i32, i32) {
    %c0_i32 = arith.constant 0 : i32
    %c0_i32_0 = arith.constant 0 : i32
    return %arg0, %arg1, %c0_i32 : i32, i32, i32
  }
}

module attributes {stable_mosaic.version = 11 : i64} {
  func.func @_flash_attn_kernel(%arg0: i32, %arg1: i32, %arg2: i32, %arg3: memref<1x8x32xf32, #tpu.memory_space<vmem>>, %arg4: memref<1x8x32xf32, #tpu.memory_space<vmem>>, %arg5: memref<1x8x32xf32, #tpu.memory_space<vmem>>, %arg6: memref<1x8x32xf32, #tpu.memory_space<vmem>>, %arg7: memref<8x1xf32, #tpu.memory_space<vmem>>, %arg8: memref<8x1xf32, #tpu.memory_space<vmem>>, %arg9: memref<8x32xf32, #tpu.memory_space<vmem>>, %arg10: memref<8x32xf32, #tpu.memory_space<vmem>>) attributes {dimension_semantics = [#tpu.dimension_semantics<parallel>, #tpu.dimension_semantics<parallel>, #tpu.dimension_semantics<arbitrary>], iteration_bounds = array<i64: 4, 1, 1>, scalar_prefetch = 0 : i64, scratch_operands = 4 : i64, tpu.core_type = #tpu.core_type<tc>, window_params = [{transform_indices = @transform_0, window_bounds = array<i64: 1, 8, 32>}, {transform_indices = @transform_1, window_bounds = array<i64: 1, 8, 32>}, {transform_indices = @transform_2, window_bounds = array<i64: 1, 8, 32>}, {transform_indices = @transform_3, window_bounds = array<i64: 1, 8, 32>}]} {
    %c0_i32 = arith.constant 0 : i32
    %0 = arith.cmpi eq, %arg2, %c0_i32 : i32
    %1 = arith.extui %0 : i1 to i32
    %c0_i32_0 = arith.constant 0 : i32
    %2 = arith.cmpi ne, %1, %c0_i32_0 : i32
    scf.if %2 {
      %cst_25 = arith.constant 0xFF800000 : f32
      %34 = vector.broadcast %cst_25 : f32 to vector<8x1xf32>
      %c0_26 = arith.constant 0 : index
      %c0_27 = arith.constant 0 : index
      %35 = vector.load %arg7[%c0_26, %c0_27] : memref<8x1xf32, #tpu.memory_space<vmem>>, vector<8x1xf32>
      tpu.vector_store %arg7[%c0_26, %c0_27], %34 {strides = array<i32>} : memref<8x1xf32, #tpu.memory_space<vmem>>, vector<8x1xf32>,
      %cst_28 = arith.constant 0.000000e+00 : f32
      %36 = vector.broadcast %cst_28 : f32 to vector<8x1xf32>
      %c0_29 = arith.constant 0 : index
      %c0_30 = arith.constant 0 : index
      %37 = vector.load %arg8[%c0_29, %c0_30] : memref<8x1xf32, #tpu.memory_space<vmem>>, vector<8x1xf32>
      tpu.vector_store %arg8[%c0_29, %c0_30], %36 {strides = array<i32>} : memref<8x1xf32, #tpu.memory_space<vmem>>, vector<8x1xf32>,
      %cst_31 = arith.constant 0.000000e+00 : f32
      %38 = vector.broadcast %cst_31 : f32 to vector<8x32xf32>
      %c0_32 = arith.constant 0 : index
      %c0_33 = arith.constant 0 : index
      %39 = vector.load %arg9[%c0_32, %c0_33] : memref<8x32xf32, #tpu.memory_space<vmem>>, vector<8x32xf32>
      tpu.vector_store %arg9[%c0_32, %c0_33], %38 {strides = array<i32>} : memref<8x32xf32, #tpu.memory_space<vmem>>, vector<8x32xf32>,
      %c0_34 = arith.constant 0 : index
      %c0_35 = arith.constant 0 : index
      %c0_36 = arith.constant 0 : index
      %40 = vector.load %arg3[%c0_34, %c0_35, %c0_36] : memref<1x8x32xf32, #tpu.memory_space<vmem>>, vector<1x8x32xf32>
      %41 = vector.shape_cast %40 : vector<1x8x32xf32> to vector<8x32xf32>
      %cst_37 = arith.constant 0.176776692 : f32
      %42 = vector.broadcast %cst_37 : f32 to vector<8x32xf32>
      %43 = arith.mulf %41, %42 : vector<8x32xf32>
      %c0_38 = arith.constant 0 : index
      %c0_39 = arith.constant 0 : index
      %44 = vector.load %arg10[%c0_38, %c0_39] : memref<8x32xf32, #tpu.memory_space<vmem>>, vector<8x32xf32>
      tpu.vector_store %arg10[%c0_38, %c0_39], %43 {strides = array<i32>} : memref<8x32xf32, #tpu.memory_space<vmem>>, vector<8x32xf32>,
    } else {
    }
    %c0 = arith.constant 0 : index
    %c0_1 = arith.constant 0 : index
    %3 = vector.load %arg10[%c0, %c0_1] : memref<8x32xf32, #tpu.memory_space<vmem>>, vector<8x32xf32>
    %c0_2 = arith.constant 0 : index
    %c0_3 = arith.constant 0 : index
    %c0_4 = arith.constant 0 : index
    %4 = vector.load %arg4[%c0_2, %c0_3, %c0_4] : memref<1x8x32xf32, #tpu.memory_space<vmem>>, vector<1x8x32xf32>
    %5 = vector.shape_cast %4 : vector<1x8x32xf32> to vector<8x32xf32>
    %cst = arith.constant dense<0.000000e+00> : vector<8x8xf32>
    %6 = tpu.matmul %3, %5, %cst {dimension_numbers = #tpu.dot_dimension_numbers<[1], [1], [0], [0], [0, 0, 1, 0], [], []>} : vector<8x32xf32>, vector<8x32xf32>, vector<8x8xf32> -> vector<8x8xf32>
    %c0_5 = arith.constant 0 : index
    %c0_6 = arith.constant 0 : index
    %7 = vector.load %arg7[%c0_5, %c0_6] : memref<8x1xf32, #tpu.memory_space<vmem>>, vector<8x1xf32>
    %cst_7 = arith.constant dense<0xFF800000> : vector<8xf32>
    %8 = vector.multi_reduction <maximumf>, %6, %cst_7 [1] : vector<8x8xf32> to vector<8xf32>
    %9 = vector.shape_cast %8 : vector<8xf32> to vector<8x1xf32>
    %10 = arith.maximumf %7, %9 : vector<8x1xf32>
    %11 = arith.subf %7, %10 : vector<8x1xf32>
    %12 = math.exp %11 : vector<8x1xf32>
    %13 = vector.broadcast %10 : vector<8x1xf32> to vector<8x8xf32>
    %14 = arith.subf %6, %13 : vector<8x8xf32>
    %15 = math.exp %14 : vector<8x8xf32>
    %cst_8 = arith.constant dense<0.000000e+00> : vector<8xf32>
    %16 = vector.multi_reduction <add>, %15, %cst_8 [1] : vector<8x8xf32> to vector<8xf32>
    %17 = vector.shape_cast %16 : vector<8xf32> to vector<8x1xf32>
    %c0_9 = arith.constant 0 : index
    %c0_10 = arith.constant 0 : index
    %c0_11 = arith.constant 0 : index
    %18 = vector.load %arg5[%c0_9, %c0_10, %c0_11] : memref<1x8x32xf32, #tpu.memory_space<vmem>>, vector<1x8x32xf32>
    %19 = vector.shape_cast %18 : vector<1x8x32xf32> to vector<8x32xf32>
    %cst_12 = arith.constant dense<0.000000e+00> : vector<8x32xf32>
    %20 = tpu.matmul %15, %19, %cst_12 {dimension_numbers = #tpu.dot_dimension_numbers<[1], [0], [0], [1], [0, 0, 1, 1], [], []>} : vector<8x8xf32>, vector<8x32xf32>, vector<8x32xf32> -> vector<8x32xf32>
    %c0_13 = arith.constant 0 : index
    %c0_14 = arith.constant 0 : index
    %21 = vector.load %arg8[%c0_13, %c0_14] : memref<8x1xf32, #tpu.memory_space<vmem>>, vector<8x1xf32>
    %22 = arith.mulf %12, %21 : vector<8x1xf32>
    %23 = arith.addf %22, %17 : vector<8x1xf32>
    %c0_15 = arith.constant 0 : index
    %c0_16 = arith.constant 0 : index
    %24 = vector.load %arg8[%c0_15, %c0_16] : memref<8x1xf32, #tpu.memory_space<vmem>>, vector<8x1xf32>
    tpu.vector_store %arg8[%c0_15, %c0_16], %23 {strides = array<i32>} : memref<8x1xf32, #tpu.memory_space<vmem>>, vector<8x1xf32>,
    %c0_17 = arith.constant 0 : index
    %c0_18 = arith.constant 0 : index
    %25 = vector.load %arg9[%c0_17, %c0_18] : memref<8x32xf32, #tpu.memory_space<vmem>>, vector<8x32xf32>
    %26 = vector.broadcast %12 : vector<8x1xf32> to vector<8x32xf32>
    %27 = arith.mulf %26, %25 : vector<8x32xf32>
    %28 = arith.addf %27, %20 : vector<8x32xf32>
    %c0_19 = arith.constant 0 : index
    %c0_20 = arith.constant 0 : index
    %29 = vector.load %arg9[%c0_19, %c0_20] : memref<8x32xf32, #tpu.memory_space<vmem>>, vector<8x32xf32>
    tpu.vector_store %arg9[%c0_19, %c0_20], %28 {strides = array<i32>} : memref<8x32xf32, #tpu.memory_space<vmem>>, vector<8x32xf32>,
    %c0_21 = arith.constant 0 : index
    %c0_22 = arith.constant 0 : index
    %30 = vector.load %arg7[%c0_21, %c0_22] : memref<8x1xf32, #tpu.memory_space<vmem>>, vector<8x1xf32>
    tpu.vector_store %arg7[%c0_21, %c0_22], %10 {strides = array<i32>} : memref<8x1xf32, #tpu.memory_space<vmem>>, vector<8x1xf32>,
    %c0_i32_23 = arith.constant 0 : i32
    %31 = arith.cmpi eq, %arg2, %c0_i32_23 : i32
    %32 = arith.extui %31 : i1 to i32
    %c0_i32_24 = arith.constant 0 : i32
    %33 = arith.cmpi ne, %32, %c0_i32_24 : i32
    scf.if %33 {
      %c0_25 = arith.constant 0 : index
      %c0_26 = arith.constant 0 : index
      %34 = vector.load %arg8[%c0_25, %c0_26] : memref<8x1xf32, #tpu.memory_space<vmem>>, vector<8x1xf32>
      %35 = tpu.reciprocal %34 {approx = true} : vector<8x1xf32> -> vector<8x1xf32>
      %c0_27 = arith.constant 0 : index
      %c0_28 = arith.constant 0 : index
      %36 = vector.load %arg9[%c0_27, %c0_28] : memref<8x32xf32, #tpu.memory_space<vmem>>, vector<8x32xf32>
      %37 = vector.broadcast %35 : vector<8x1xf32> to vector<8x32xf32>
      %38 = arith.mulf %36, %37 : vector<8x32xf32>
      %c0_29 = arith.constant 0 : index
      %c0_30 = arith.constant 0 : index
      %c0_31 = arith.constant 0 : index
      %39 = vector.load %arg6[%c0_29, %c0_30, %c0_31] : memref<1x8x32xf32, #tpu.memory_space<vmem>>, vector<1x8x32xf32>
      %40 = vector.shape_cast %39 : vector<1x8x32xf32> to vector<8x32xf32>
      %41 = vector.shape_cast %38 : vector<8x32xf32> to vector<1x8x32xf32>
      tpu.vector_store %arg6[%c0_29, %c0_30, %c0_31], %41 {strides = array<i32>} : memref<1x8x32xf32, #tpu.memory_space<vmem>>, vector<1x8x32xf32>,
    } else {
    }
    return
  }
  func.func @transform_0(%arg0: i32, %arg1: i32, %arg2: i32) -> (i32, i32, i32) {
    %c0_i32 = arith.constant 0 : i32
    %c0_i32_0 = arith.constant 0 : i32
    return %arg0, %arg1, %c0_i32 : i32, i32, i32
  }
  func.func @transform_1(%arg0: i32, %arg1: i32, %arg2: i32) -> (i32, i32, i32) {
    %c0_i32 = arith.constant 0 : i32
    %c0_i32_0 = arith.constant 0 : i32
    return %arg0, %arg2, %c0_i32 : i32, i32, i32
  }
  func.func @transform_2(%arg0: i32, %arg1: i32, %arg2: i32) -> (i32, i32, i32) {
    %c0_i32 = arith.constant 0 : i32
    %c0_i32_0 = arith.constant 0 : i32
    return %arg0, %arg2, %c0_i32 : i32, i32, i32
  }
  func.func @transform_3(%arg0: i32, %arg1: i32, %arg2: i32) -> (i32, i32, i32) {
    %c0_i32 = arith.constant 0 : i32
    %c0_i32_0 = arith.constant 0 : i32
    return %arg0, %arg1, %c0_i32 : i32, i32, i32
  }
}

</mosaic_0001>

<bundles_post_ra>
// kernel: tpu_custom_call.1
= control target key start
LH: loop header
LB: loop body
LE: loop exit
PB: predicated region body
PF: predicated region fallthrough
CT: control target
= control target key end

     0   :  { %s1244_s0 = inlined_call_operand.hbm [shape: f32[4,8,32], index: 0, kind: input, shape index: {}]   ;;  %s1245_s1 = inlined_call_operand.hbm [shape: f32[4,8,32], index: 1, kind: input, shape index: {}]   ;;  %s1246_s2 = inlined_call_operand.hbm [shape: f32[4,8,32], index: 2, kind: input, shape index: {}]   ;;  %s1247_s3 = inlined_call_operand.hbm [shape: f32[4,8,32], index: 3, kind: output, shape index: {}]  }
   0x1   :  { %1253 = sst [smem:[#allocation19_spill]] %s1245_s1 }
   0x2   :  { %8 = vsyncpa [#allocation7], 0 }
   0x3   :  { %10 = vsyncpa [#allocation7 + $0x1], 0 }
   0x4   :  { %11 = vsyncpa [#allocation10], 0 }
   0x5   :  { %13 = vsyncpa [#allocation10 + $0x1], 0 }
   0x6   :  { %14 = vsyncpa [#allocation8], 0 }
   0x7   :  { %16 = vsyncpa [#allocation8 + $0x1], 0  ;;  %s969_s12 = smov 0   ;;  %s971_s13 = smov 0  }
   0x8   :  { %s973_s14 = smov 0   ;;  %s975_s15 = smov 0  }
   0x9   :  { %s977_s16 = smov 0   ;;  %s979_s17 = smov 0  }
   0xa LB: > { %1254 = sst [smem:[#allocation16_spill]] %s935_s16  ;;  %s1000_s18 = sadd.s32 4294967295, %s939_s17   ;;  %s939_s17 = sphi %s979_s17, %s22_s17   ;;  %s935_s16 = sphi %s977_s16, %s1274_s16   ;;  %s931_s15 = sphi %s975_s15, %s1273_s15   ;;  %s927_s14 = sphi %s973_s14, %s1277_s14   ;;  %s923_s13 = sphi %s971_s13, %s1276_s13   ;;  %s919_s12 = sphi %s969_s12, %s1275_s12  }
   0xb   : > { %s644_s19 = sadd.s32 4294967294, %s939_s17   ;;  %s41_s20 = sadd.s32 1, %s935_s16 }
   0xc   : > { %s50_s21 = sadd.s32 1, %s927_s14  ;;  %p43_p0 = scmp.ge.s32.totalorder %s41_s20, 4 }
   0xd   : > { %p57_p1 = scmp.ne.s32.totalorder %s927_s14, %s923_s13  ;;  %p58_p2 = scmp.eq.s32.totalorder %s939_s17, 0 }
   0xe   : > { %p63_p3 = scmp.ne.s32.totalorder %s923_s13, %s919_s12  ;;  %s1279_s20 = smov (%p43_p0, %s41_s20), 0 }
   0xf   : > { %1255 = sst [smem:[#allocation17_spill]] %s1279_s20  ;;  %p1012_p4 = por %p58_p2, %p57_p1 }
  0x10   : > { %p64_p5 = scmp.eq.s32.totalorder %s1000_s18, 0  ;;  %s45_s23 = ssub.s32 %s935_s16, %s1279_s20 }
  0x11   : > { %p145_p6 = scmp.eq.s32.totalorder %s1000_s18, 3  ;;  %p48_p7 = scmp.eq.s32.totalorder %s45_s23, 0 }
  0x12   : > { %p1020_p8 = por %p64_p5, %p63_p3  ;;  %p151_p10 = scmp.eq.s32.totalorder %s644_s19, 3 }
  0x13   : > { %p1024_p9 = por %p145_p6, %p57_p1  ;;  %p701_p12 = scmp.lt.s32.totalorder %s939_s17, 4 }
  0x14   : > { %s1257_s24 = scalar_select %p1020_p8, 1, 0 }
  0x15   : > { %s1258_s25 = scalar_select %p1024_p9, 1, 0 }
  0x16   : > { %s1029_s26 = scalar_select %p48_p7, %s927_s14, %s50_s21  }
  0x17   : > { %p1031_p11 = por %p151_p10, %p63_p3  ;;  %s171_s28 = sand.u32 1, %s927_s14  }
  0x18   : > { %1259 = sst [smem:[#allocation18_spill]] %s1029_s26  ;;  %s1039_s29 = sshll.u32 %s171_s28, 3 }
  0x19   : > { %s1260_s27 = scalar_select %p1031_p11, 1, 0 }
  0x1a   : > { %s1042_s30 = sshll.u32 %s935_s16, 7  ;;  %p1046_p13 = pnand %p701_p12, %p1012_p4 }
  0x1b   : > { %s190_s5 = sand.u32 1, %s939_s17   ;;  %s1262_s1 = sld [smem:[#allocation19_spill]] }
  0x1c   : > { %s1261_s4 = scalar_select %p1046_p13, 1, 0 }
  0x1d   : > { %s194_s9 = scalar_lea.vmem [#allocation9], %s1039_s29  ;;  %s1062_s11 = scalar_lea.sflag [#allocation10], %s190_s5 }
  0x1e   : > { %s202_s10 = sshll.u32 %s194_s9, 4  ;;  %p1068_p3 = pneg %p1046_p13  ;;  %s1059_s10 = int_to_ptr.vmem [resolvable:$true] %s202_s10 }
  0x21   : > { %s1055_s8 = scalar_lea.hbm %s1262_s1, %s1042_s30  ;;  %s768_s6 = scalar_lea.hbm %s1262_s1, 512 }
  0x22   : > { %s763_s19 = scalar_lea.hbm %s1055_s8, 128  ;;  %p769_p6 = scmp.lt.u32.totalorder %s1055_s8, %s1262_s1 }
  0x23   : > { %p764_p2 = scmp.ne.s32.totalorder %s1055_s8, %s763_s19  ;;  %p770_p7 = scmp.lt.u32.totalorder %s768_s6, %s763_s19 }
  0x24   : > { %p772_p12 = scmp.lt.u32.totalorder %s763_s19, %s1055_s8 }
  0x25   : > { %p766_p4 = pnand %p1068_p3, %p764_p2  ;;  %p771_p10 = por %p770_p7, %p769_p6 }
  0x27   : > { %p767_p5 = pneg %p766_p4  ;;  %p773_p0 = por %p772_p12, %p771_p10 }
  0x29   : > { %p774_p1 = pnand %p773_p0, %p767_p5 }
  0x2b   : > { %777 = shalt.err (!%p774_p1)
}
  0x2c   : > { %s778_s5 = scalar_lea.vmem %s1059_s10, 128  ;;  %s941_s22 = smov [#allocation9]  }
  0x2d   : > { %p779_p2 = scmp.ne.s32.totalorder %s1059_s10, %s778_s5  ;;  %s783_s23 = sshll.u32 %s941_s22, 4  ;;  %s784_s23 = int_to_ptr.vmem [resolvable:$false] %s783_s23 }
  0x2e   : > { %s785_s7 = scalar_lea.vmem %s784_s23, 256  ;;  %p786_p9 = scmp.lt.s32.totalorder %s1059_s10, %s784_s23 }
  0x2f   : > { %p781_p4 = pnand %p779_p2, %p1068_p3  ;;  %p787_p8 = scmp.lt.s32.totalorder %s785_s7, %s778_s5 }
  0x31   : > { %p782_p11 = pneg %p781_p4  ;;  %p788_p6 = por %p787_p8, %p786_p9 }
  0x33   : > { %p789_p7 = pnand %p788_p6, %p782_p11 }
  0x35   : > { %792 = shalt.err (!%p789_p7)
}
  0x36   : > { %693 = dma.hbm_to_vmem [thread:$0]  (!%p1046_p13), %s1055_s8, 128, %s1059_s10, %s1062_s11  }
  0x37   : > { %p1264_p0 = scmp.lt.s32.totalorder %s939_s17, 5  ;;  %p1265_p1 = scmp.ge.s32.totalorder %s939_s17, 1 }
  0x38   : > { %s1104_s5 = scalar_lea.hbm %s1244_s0, %s1042_s30  ;;  %s175_s22 = scalar_lea.vmem [#allocation6], %s1039_s29 }
  0x39   : > { %p1096_p5 = pnand %p1265_p1, %p1264_p0  ;;  %s183_s23 = sshll.u32 %s175_s22, 4  ;;  %s1107_s23 = int_to_ptr.vmem [resolvable:$true] %s183_s23 }
  0x3a   : > { %s1113_s7 = scalar_lea.hbm %s1246_s2, %s1042_s30  ;;  %s172_s1 = scalar_lea.sflag [#allocation7], %s171_s28 }
  0x3b   : > { %s1266_s19 = scalar_select %p1096_p5, 1, 0 }
  0x3c   : > { %s793_s20 = scalar_lea.hbm %s1104_s5, 128  ;;  %s798_s16 = scalar_lea.hbm %s1244_s0, 512 }
  0x3d   : > { %p794_p8 = scmp.ne.s32.totalorder %s1104_s5, %s793_s20  ;;  %p799_p10 = scmp.lt.u32.totalorder %s1104_s5, %s1244_s0 }
  0x3e   : > { %p800_p12 = scmp.lt.u32.totalorder %s798_s16, %s793_s20  ;;  %p802_p4 = scmp.lt.u32.totalorder %s793_s20, %s1104_s5 }
  0x3f   : > { %p796_p9 = pnand %p794_p8, %p1068_p3 }
  0x40   : > { %p801_p2 = por %p800_p12, %p799_p10 }
  0x41   : > { %p797_p11 = pneg %p796_p9 }
  0x42   : > { %p803_p6 = por %p802_p4, %p801_p2 }
  0x44   : > { %p804_p7 = pnand %p803_p6, %p797_p11 }
  0x46   : > { %807 = shalt.err (!%p804_p7)
}
  0x47   : > { %s808_s28 = scalar_lea.vmem %s1107_s23, 128  ;;  %s942_s30 = smov [#allocation6]  }
  0x48   : > { %p809_p0 = scmp.ne.s32.totalorder %s1107_s23, %s808_s28  ;;  %s813_s8 = sshll.u32 %s942_s30, 4  ;;  %s814_s8 = int_to_ptr.vmem [resolvable:$false] %s813_s8 }
  0x49   : > { %s815_s26 = scalar_lea.vmem %s814_s8, 256  ;;  %p816_p9 = scmp.lt.s32.totalorder %s1107_s23, %s814_s8 }
  0x4a   : > { %p811_p1 = pnand %p809_p0, %p1068_p3  ;;  %p817_p5 = scmp.lt.s32.totalorder %s815_s26, %s808_s28 }
  0x4c   : > { %p812_p8 = pneg %p811_p1  ;;  %p818_p10 = por %p817_p5, %p816_p9 }
  0x4e   : > { %p819_p12 = pnand %p818_p10, %p812_p8 }
  0x50   : > { %822 = shalt.err (!%p819_p12)
}
  0x51   : > { %690 = dma.hbm_to_vmem [thread:$0]  (!%p1046_p13), %s1104_s5, 128, %s1107_s23, %s172_s1  }
  0x52   : > { %s213_s16 = scalar_lea.vmem [#allocation11], %s1039_s29  ;;  %s823_s10 = scalar_lea.hbm %s1113_s7, 128 }
  0x53   : > { %s221_s20 = sshll.u32 %s213_s16, 4  ;;  %p824_p11 = scmp.ne.s32.totalorder %s1113_s7, %s823_s10  ;;  %s222_s20 = int_to_ptr.vmem [resolvable:$true] %s221_s20 }
  0x54   : > { %s828_s22 = scalar_lea.hbm %s1246_s2, 512  ;;  %p829_p4 = scmp.lt.u32.totalorder %s1113_s7, %s1246_s2 }
  0x55   : > { %p826_p5 = pnand %p824_p11, %p1068_p3  ;;  %p830_p6 = scmp.lt.u32.totalorder %s828_s22, %s823_s10 }
  0x56   : > { %p832_p0 = scmp.lt.u32.totalorder %s823_s10, %s1113_s7 }
  0x57   : > { %p827_p2 = pneg %p826_p5  ;;  %p831_p7 = por %p830_p6, %p829_p4 }
  0x59   : > { %p833_p1 = por %p832_p0, %p831_p7 }
  0x5b   : > { %p834_p8 = pnand %p833_p1, %p827_p2 }
  0x5d   : > { %837 = shalt.err (!%p834_p8)
}
  0x5e   : > { %s838_s1 = scalar_lea.vmem %s222_s20, 128  ;;  %s943_s29 = smov [#allocation11]  }
  0x5f   : > { %p839_p9 = scmp.ne.s32.totalorder %s222_s20, %s838_s1  ;;  %s843_s5 = sshll.u32 %s943_s29, 4  ;;  %s844_s5 = int_to_ptr.vmem [resolvable:$false] %s843_s5 }
  0x60   : > { %s845_s23 = scalar_lea.vmem %s844_s5, 256  ;;  %p846_p11 = scmp.lt.s32.totalorder %s222_s20, %s844_s5 }
  0x61   : > { %p841_p10 = pnand %p839_p9, %p1068_p3  ;;  %p847_p5 = scmp.lt.s32.totalorder %s845_s23, %s838_s1 }
  0x63   : > { %p842_p12 = pneg %p841_p10  ;;  %p848_p13 = por %p847_p5, %p846_p11 }
  0x65   : > { %p849_p4 = pnand %p848_p13, %p842_p12 }
  0x67   : > { %852 = shalt.err (!%p849_p4)
}
  0x68   : > { %p1267_p6 = scmp.ne.s32.totalorder %s1261_s4, 0  ;;  %p1268_p2 = scmp.ne.s32.totalorder %s1266_s19, 0 }
  0x69   : > { %s1160_s21 = sand.u32 (!%p1268_p2), 1, %s923_s13   ;;  %p1269_p13 = scmp.ne.s32.totalorder (!%p1268_p2), %s1257_s24, 0 }
  0x6a   : > { %696 = dma.hbm_to_vmem [thread:$0]  (!%p1267_p6), %s1113_s7, 128, %s222_s20, %s1062_s11  }
  0x6b   : > { %230 = sbr.rel (%p1268_p2) target bundleno = 937 (0x3a9), region = 32  ;;  %s1163_s8 = sshll.u32 (!%p1268_p2), %s1160_s21, 3 }
  0x6c   : > { %s233_s26 = scalar_lea.sflag (!%p1268_p2), [#allocation7], %s1160_s21  ;;  %s236_s16 = scalar_lea.vmem (!%p1268_p2), [#allocation6], %s1163_s8 }
  0x72   : > { %906 = dma.done.wait (%p1269_p13), %s233_s26, 128  }
  0x73   : > { %908 = vsyncadd (%p1269_p13), %s233_s26, 4294967168  ;;  %s241_s4 = sand.u32 1, %s1000_s18   ;;  %s245_s19 = scalar_lea.vmem [#allocation9], %s1163_s8 }
  0x74   : > { %s242_s11 = scalar_lea.sflag [#allocation10], %s241_s4 }
  0x75   : > { %910 = dma.done.wait (%p1269_p13), %s242_s11, 256  }
  0x76   : > { %912 = vsyncadd (%p1269_p13), %s242_s11, 4294967040  ;;  %vm294_vm0 = vcmask 261120   ;;  %v944_v0 = vmov 0.0   ;;  %vm945_vm1 = vmmov 0   ;;  %v296_v1 = vld [vmem:[%s236_s16] sm:$0xff]  ;;  %v300_v2 = vld [vmem:[%s245_s19] sm:$0xff] }
  0x77   : > { %669 = vmatprep.subr.mxu0 %v944_v0  ;;  %295 = vst.msk [vmem:[#allocation4] sm:$0xff] %vm294_vm0, %v944_v0  ;;  %671 = vmatprep.mubr.msk.f32.mxu0 %vm945_vm1, %v944_v0  ;;  %v297_v3 = vmul.f32 0.17677669, %v296_v1  ;;  %vm291_vm2 = vcmask 7168   ;;  %v946_v5 = vmov -inf   ;;  %vm379_vm3 = vcmask 64512  }
  0x78   : > { %674 = vmatprep.subr.mxu1 %v944_v0  ;;  %676 = vmatprep.mubr.msk.f32.mxu1 %vm945_vm1, %v944_v0  ;;  %292 = vst.msk [vmem:[#allocation2] sm:$0xff] %vm291_vm2, %v946_v5  ;;  %293 = vst.msk [vmem:[#allocation3] sm:$0xff] %vm291_vm2, %v944_v0  ;;  %v947_v9 = vmov 0   ;;  %s254_s18 = scalar_lea.vmem [#allocation11], %s1163_s8  ;;  %s662_s24 = sshll.u32 %s931_s15, 7 }
  0x79   : > { %670 = vmatpush3.xpose.msk.msra.mxu0 %vm294_vm0, %v300_v2  ;;  %298 = vst.msk [vmem:[#allocation5] sm:$0xff] %vm294_vm0, %v297_v3  ;;  %755 = vset.pattern.permute.xlu0 %v947_v9  ;;  %v398_v14 = vld [vmem:[%s254_s18] sm:$0xff]  ;;  %s286_s7 = scalar_lea.vmem [#allocation12], %s1163_s8  ;;  %s1195_s9 = scalar_lea.hbm %s1247_s3, %s662_s24 }
  0x7a   : > { %756 = vset.pattern.permute.xlu1 %v947_v9  ;;  %675 = vmatpush3.msra.mxu1 %v398_v14  ;;  %s515_s20 = sshll.u32 %s286_s7, 4  ;;  %s501_s22 = scalar_lea.sflag [#allocation8], %s1160_s21  ;;  %s1197_s20 = int_to_ptr.vmem [resolvable:$true] %s515_s20 }
  0x7b   : > { %s853_s28 = scalar_lea.vmem %s1197_s20, 128  ;;  %p1270_p7 = scmp.ne.s32.totalorder %s1258_s25, 0 }
  0x7c   : > { %p854_p3 = scmp.ne.s32.totalorder %s1197_s20, %s853_s28  ;;  %s948_s15 = smov [#allocation12]  }
  0x7d   : > { %s857_s30 = sshll.u32 %s948_s15, 4  ;;  %s858_s30 = int_to_ptr.vmem [resolvable:$false] %s857_s30 }
  0x7e   : > { %v477_v28 = vld [vmem:[#allocation4] sm:$0xff]  ;;  %p855_p0 = pnand %p854_p3, %p1270_p7  ;;  %s859_s1 = scalar_lea.vmem %s858_s30, 256 }
  0x7f   : > { %v378_v10 = vld [vmem:[#allocation2] sm:$0xff]  ;;  %v472_v22 = vld [vmem:[#allocation3] sm:$0xff]  ;;  %p860_p8 = scmp.lt.s32.totalorder %s1197_s20, %s858_s30  ;;  %p861_p9 = scmp.lt.s32.totalorder %s859_s1, %s853_s28 }
  0x80   : > { %v299_v4 = vld [vmem:[#allocation5] sm:$0xff]  ;;  %p856_p1 = pneg %p855_p0 }
  0x81   : > { %672 = vmatmul.mubr.msk.f32.vlgmr.msra.gmra.mrb[0].mxu0 %vm294_vm0, %v299_v4  ;;  %p862_p10 = por %p861_p9, %p860_p8 }
  0x83   : > { %p863_p12 = pnand %p862_p10, %p856_p1 }
 0x154   : > { %v374_v6 = vpop.f32.mrb[0].mxu0 }
 0x155   : > { %v673_v7 = vpop.f32.mrb[1].mxu0  ;;  %v380_v8 = vsel %vm379_vm3, %v374_v6, -inf }
 0x156   : > { %381 = vmax.xlane.f32.xlu0 %v380_v8 }
 0x1e3   : > { %v382_v11 = vpop.xlane.xlu0 %381 }
 0x1e4   : > { %v383_v12 = vmax.f32 %v378_v10, %v382_v11 }
 0x1e6   : > { %v384_v13 = vsub.f32 %v378_v10, %v383_v12  ;;  %486 = vst.msk [vmem:[#allocation2] sm:$0xff] %vm291_vm2, %v383_v12  ;;  %389 = vperm.xlu0 %755, %v383_v12  }
 0x1e8   : > { %v385_v20 = vmul.f32 1.442695, %v384_v13 }
 0x265   : > { %v390_v15 = vpop.permute.xlu0 %389 }
 0x266   : > { %v392_v16 = vsub.f32 %v374_v6, %v390_v15 }
 0x268   : > { %v393_v17 = vmul.f32 1.442695, %v392_v16 }
 0x26a   : > { %757 = vpow2.f32 %v393_v17 }
 0x26b   : > { %759 = vpow2.f32 %v385_v20 }
 0x274   : > { %v758_v18 = vpop.eup %757 }
 0x275   : > { %677 = vmatmul.mubr.msk.f32.vlgmr.msra.gmra.mrb[0].mxu1 %vm379_vm3, %v758_v18  ;;  %v395_v19 = vsel %vm379_vm3, %v758_v18, 0.0  ;;  %v760_v21 = vpop.eup %759 }
 0x276   : > { %396 = vadd.xlane.f32.xlu1 %v395_v19  ;;  %v473_v23 = vmul.f32 %v760_v21, %v472_v22 }
 0x287   : > { %480 = vperm.xlu1 %756, %v760_v21  }
 0x303   : > { %v397_v24 = vpop.xlane.xlu1 %396 }
 0x304   : > { %v474_v25 = vadd.f32 %v473_v23, %v397_v24 }
 0x306   : > { %476 = vst.msk [vmem:[#allocation3] sm:$0xff] %vm291_vm2, %v474_v25 }
 0x307   : > { %v481_v29 = vpop.permute.xlu1 %480 }
 0x308   : > { %v483_v30 = vmul.f32 %v481_v29, %v477_v28 }
 0x30d   : > { %v490_v26 = vld [vmem:[#allocation3] sm:$0xff] }
 0x30e   : > { %761 = vrcp.f32 %v490_v26 }
 0x318   : > { %v762_v27 = vpop.eup %761 }
 0x319   : > { %495 = vperm.xlu1 %756, %v762_v27  }
 0x348   : > { %v468_v31 = vpop.f32.mrb[0].mxu1 }
 0x349   : > { %v484_v32 = vadd.f32 %v483_v30, %v468_v31  ;;  %v678_v33 = vpop.f32.mrb[1].mxu1 }
 0x34b   : > { %485 = vst.msk [vmem:[#allocation4] sm:$0xff] %vm294_vm0, %v484_v32 }
 0x352   : > { %v492_v34 = vld [vmem:[#allocation4] sm:$0xff] }
 0x398   : > { %v496_v35 = vpop.permute.xlu1 %495 }
 0x399   : > { %v498_v36 = vmul.f32 %v496_v35, %v492_v34 }
 0x39b   : > { %499 = vst.msk [vmem:[%s286_s7] sm:$0xff] %vm294_vm0, %v498_v36 }
 0x39c   : > { %866 = shalt.err (!%p863_p12)
}
 0x39d   : > { %s867_s29 = scalar_lea.hbm %s1195_s9, 128  ;;  %s871_s21 = scalar_lea.hbm %s1247_s3, 512 }
 0x39e   : > { %p868_p11 = scmp.ne.s32.totalorder %s1195_s9, %s867_s29  ;;  %p872_p6 = scmp.lt.u32.totalorder %s1195_s9, %s1247_s3 }
 0x39f   : > { %p873_p2 = scmp.lt.u32.totalorder %s871_s21, %s867_s29  ;;  %p875_p3 = scmp.lt.u32.totalorder %s867_s29, %s1195_s9 }
 0x3a0   : > { %p869_p5 = pnand %p868_p11, %p1270_p7 }
 0x3a1   : > { %p874_p13 = por %p873_p2, %p872_p6 }
 0x3a2   : > { %p870_p4 = pneg %p869_p5 }
 0x3a3   : > { %p876_p0 = por %p875_p3, %p874_p13 }
 0x3a5   : > { %p877_p1 = pnand %p876_p0, %p870_p4 }
 0x3a7   : > { %880 = shalt.err (!%p877_p1)
}
 0x3a8   : > { %685 = dma.vmem_to_hbm [thread:$0]  (%p1270_p7), %s1197_s20, 128, %s1195_s9, %s501_s22  }
 0x3a9 PF: > { %p702_p8 = scmp.ge.s32.totalorder %s939_s17, 2  ;;  %s527_s16 = sand.u32 1, %s919_s12  }
 0x3aa   : > { %p1271_p9 = scmp.ne.s32.totalorder %s1260_s27, 0  ;;  %s528_s4 = scalar_lea.sflag [#allocation8], %s527_s16 }
 0x3ac   : > { %p698_p10 = pnand %p702_p8, %p1271_p9 }
 0x3ae   : > { %914 = dma.done.wait (!%p698_p10), %s528_s4, 128  }
 0x3af   : > { %916 = vsyncadd (!%p698_p10), %s528_s4, 4294967168  ;;  %s22_s17 = sadd.s32 1, %s939_s17   ;;  %s1272_s25 = sld [smem:[#allocation18_spill]] }
 0x3b0   : > { %p19_p12 = scmp.ge.s32.totalorder %s22_s17, 6   ;;  %s1273_s15 = sld [smem:[#allocation16_spill]] }
 0x3b1   : > { %s1274_s16 = sld [smem:[#allocation17_spill]]  ;;  %s1275_s12 = smov %s923_s13 }
 0x3b2   : > { %s1276_s13 = smov %s927_s14  ;;  %21 = sbr.rel (!%p19_p12) target bundleno = 10 (0xa), region = 109 }
 0x3b5   : > { %s1277_s14 = smov %s1272_s25 }
 0x3b9   :  { %533 = vsyncpa [#allocation7], 1 }
 0x3ba   :  { %535 = vsyncpa [#allocation7 + $0x1], 1 }
 0x3bb   :  { %536 = vsyncpa [#allocation10], 1 }
 0x3bc   :  { %538 = vsyncpa [#allocation10 + $0x1], 1 }
 0x3bd   :  { %539 = vsyncpa [#allocation8], 1 }
 0x3be   :  { %541 = vsyncpa [#allocation8 + $0x1], 1 }

</bundles_post_ra>
